<compile_context>
chip_gen: v7x
topology: tpu7x:2x2x1
jax: 0.10.0
libtpu: 0.0.40
codegen_flags: <defaults>
</compile_context>

<pallas_src>
import functools

import jax
import jax.numpy as jnp
from jax.experimental import pallas as pl
from jax.experimental.pallas import tpu as pltpu

# y_dim == input_dim == hidden_dim is required for the reference forward to run.
Y_DIM = 32
INPUT_DIM = 32
HIDDEN_DIM = 32
NEG_SLOPE = 0.2              # encoder / z_inter LeakyReLU slope
DEC_SLOPE = 1.0 / NEG_SLOPE  # decoder LeakyReLU slope = 5.0 (matches nn.LeakyReLU(1/0.2))

_LINEAR_NAMES = ("enc1", "enc2", "enc3", "zmean", "zlogvar", "zinter",
                 "dec1", "dec2", "dec3")


def _round_up(a, b):
    return ((a + b - 1) // b) * b


def _cdiv(a, b):
    return -(-a // b)


# ---------------------------------------------------------------------------
# Fused per-lane-tile kernel (transposed layout: features on sublanes, frames
# on lanes).  Encoder MLP, fused posterior heads, z_inter x2, block-diagonal
# decoder over [mean ; yt_] stacked on sublanes, single packed output store.
# ---------------------------------------------------------------------------
def _fused_vae_kernel(x_ref,
                      w_enc, b_enc, w_heads, b_heads, w_zi, b_zi, w_dec, b_dec,
                      out_ref, *, act_dtype):
    D = HIDDEN_DIM
    od = out_ref.dtype

    def cast(h, dt):
        return h if h.dtype == dt else h.astype(dt)

    def leaky(a, slope):
        return jnp.where(a >= 0, a, slope * a)

    def linact(w, h, b, slope):
        # MXU inputs in w.dtype (bf16 by default), f32 accumulation; bias-add and
        # LeakyReLU run in act_dtype (bf16 on v6e/v7x; pass f32 on v5e).
        acc = jnp.dot(w, cast(h, w.dtype), preferred_element_type=jnp.float32)
        return leaky(cast(acc, act_dtype) + cast(b, act_dtype), slope)

    def linout(w, h, b):
        # f32 bias-add for values that are stored directly (mean/logvar/recon).
        return jnp.dot(w, cast(h, w.dtype), preferred_element_type=jnp.float32) + b

    x = x_ref[...]                                        # (D, tile_n) compute dtype

    # Encoder: Linear -> LeakyReLU(0.2) -> Linear -> LeakyReLU(0.2) -> Linear
    h = linact(w_enc[0], x, b_enc[0], NEG_SLOPE)
    h = linact(w_enc[1], h, b_enc[1], NEG_SLOPE)
    yt0 = linout(w_enc[2], h, b_enc[2])                   # (D, tile_n) f32

    # Fused posterior heads: rows [0:D]=z_mean, [D:2D]=z_logvar, [2D:3D]=z_inter pre-act.
    heads = linout(w_heads[...], yt0, b_heads[...])       # (3D, tile_n) f32
    mean = heads[0:D]
    logvar = heads[D:2 * D]
    yti = leaky(cast(heads[2 * D:3 * D], act_dtype), NEG_SLOPE)
    yti = linact(w_zi[...], yti, b_zi[...], NEG_SLOPE)    # second z_inter (same weights)

    # Block-diagonal decoder over z = [mean ; yti] stacked on the sublane axis:
    # blockdiag(W, W) @ [mean ; yti] == [decoder(mean) ; decoder(yti)].
    z = jnp.concatenate([cast(mean, act_dtype), yti], axis=0)     # (2D, tile_n)
    d = linact(w_dec[0], z, b_dec[0], DEC_SLOPE)
    d = linact(w_dec[1], d, b_dec[1], DEC_SLOPE)
    rec = linout(w_dec[2], d, b_dec[2])                   # (2D, tile_n) f32

    # Single packed, lane-dense output: one DMA stream, full-width stores.
    out_ref[0:D, :] = cast(mean, od)          # z_mean
    out_ref[D:2 * D, :] = cast(logvar, od)    # z_logvar
    out_ref[2 * D:3 * D, :] = cast(yti, od)   # yt_
    out_ref[3 * D:5 * D, :] = cast(rec, od)   # [recon_xt ; recon_xt_]


# ---------------------------------------------------------------------------
# Parameter initialization (deterministic, PyTorch-style uniform(-1/sqrt(fan_in)))
# Weights stored in PyTorch layout: (out_features, in_features); bias (out,).
# ---------------------------------------------------------------------------
def init_params(key):
    params = {}

    def linear(key, fan_in, fan_out):
        kw, kb = jax.random.split(key)
        bound = 1.0 / jnp.sqrt(jnp.float32(fan_in))
        w = jax.random.uniform(kw, (fan_out, fan_in), jnp.float32, -bound, bound)
        b = jax.random.uniform(kb, (fan_out,), jnp.float32, -bound, bound)
        return w, b

    keys = jax.random.split(key, len(_LINEAR_NAMES) + 4)
    for name, k in zip(_LINEAR_NAMES, keys[: len(_LINEAR_NAMES)]):
        w, b = linear(k, HIDDEN_DIM, HIDDEN_DIM)
        params[name + "_w"] = w
        params[name + "_b"] = b

    # z_prior_lstm biases (LSTMCell weights multiply zero input/state, unused)
    kb1, kb2, kpm, kpl = keys[len(_LINEAR_NAMES):]
    bound = 1.0 / jnp.sqrt(jnp.float32(HIDDEN_DIM))
    params["lstm_b_ih"] = jax.random.uniform(kb1, (4 * HIDDEN_DIM,), jnp.float32, -bound, bound)
    params["lstm_b_hh"] = jax.random.uniform(kb2, (4 * HIDDEN_DIM,), jnp.float32, -bound, bound)
    params["pmean_w"], params["pmean_b"] = linear(kpm, HIDDEN_DIM, Y_DIM)
    params["plogvar_w"], params["plogvar_b"] = linear(kpl, HIDDEN_DIM, Y_DIM)
    return params


# ---------------------------------------------------------------------------
# Prior path (sample_y): the LSTMCell sees zero input and zero state, so the
# gates reduce to a bias-only scalar path independent of the batch -> tiny,
# computed in plain-JAX glue and broadcast.
# ---------------------------------------------------------------------------
def _prior(params, batch_size):
    gates = params["lstm_b_ih"] + params["lstm_b_hh"]          # (4H,)
    i, f, g, o = jnp.split(gates, 4)
    i = jax.nn.sigmoid(i)
    f = jax.nn.sigmoid(f)                                       # multiplies c=0
    g = jnp.tanh(g)
    o = jax.nn.sigmoid(o)
    c = i * g
    h = o * jnp.tanh(c)                                         # (H,)
    y_mean = h @ params["pmean_w"].T + params["pmean_b"]        # (y_dim,)
    y_logvar = h @ params["plogvar_w"].T + params["plogvar_b"]  # (y_dim,)
    y_mean = jnp.broadcast_to(y_mean[None, None, :], (batch_size, 1, Y_DIM))
    y_logvar = jnp.broadcast_to(y_logvar[None, None, :], (batch_size, 1, Y_DIM))
    return y_mean, y_logvar


# ---------------------------------------------------------------------------
# Forward wrapper (eval mode)
# ---------------------------------------------------------------------------
def temporal_vae_forward(xt, xt_, params, *, tile_n=4096,
                         compute_dtype=jnp.bfloat16, act_dtype=None,
                         out_dtype=jnp.float32):
    """compute_dtype: MXU input dtype (f32 accumulation regardless).
    act_dtype: elementwise dtype (defaults to compute_dtype; use f32 on v5e).
    out_dtype: HBM output dtype (bfloat16 halves writeback + relayout; v5e win)."""
    del xt_  # unused by the reference forward
    D = HIDDEN_DIM
    B = xt.shape[0]
    act_dtype = compute_dtype if act_dtype is None else act_dtype

    x = xt.reshape(-1, INPUT_DIM)
    N = x.shape[0]

    # ----- frame-axis tiling: big lane-dense tiles, minimal padding, >=2 steps
    # when possible so v7x can shard the "parallel" axis over its 2 TensorCores.
    n128 = _round_up(max(N, 1), 128)
    tile_cap = _round_up(min(max(int(tile_n), 128), n128), 128)
    num_tiles = _cdiv(n128, tile_cap)
    if n128 >= 256:
        num_tiles = max(num_tiles, 2)
    tile = _round_up(_cdiv(n128, num_tiles), 128)   # equalized tiles -> waste < 128/tile
    n_pad = tile * num_tiles

    # Cast BEFORE the relayout (halves its HBM read); pad only to n_pad.
    x = x.astype(compute_dtype)
    if n_pad != N:
        x = jnp.pad(x, ((0, n_pad - N), (0, 0)))
    x_t = x.T                                        # (D, n_pad): frames on lanes

    # ----- pack the 9 Linears into stacked operands (PyTorch (out, in) layout).
    cd = compute_dtype
    wp = lambda n: params[n + "_w"].astype(cd)
    bp = lambda n: params[n + "_b"].astype(jnp.float32)

    w_enc = jnp.stack([wp("enc1"), wp("enc2"), wp("enc3")])              # (3, D, D)
    b_enc = jnp.stack([bp("enc1"), bp("enc2"), bp("enc3")])[..., None]   # (3, D, 1)
    w_heads = jnp.concatenate([wp("zmean"), wp("zlogvar"), wp("zinter")], 0)   # (3D, D)
    b_heads = jnp.concatenate([bp("zmean"), bp("zlogvar"), bp("zinter")])[:, None]
    w_zi = wp("zinter")                                                  # (D, D)
    b_zi = bp("zinter")[:, None]                                         # (D, 1)

    def blockdiag(w):
        zero = jnp.zeros_like(w)
        return jnp.concatenate([jnp.concatenate([w, zero], axis=1),
                                jnp.concatenate([zero, w], axis=1)], axis=0)

    w_dec = jnp.stack([blockdiag(wp(n)) for n in ("dec1", "dec2", "dec3")])        # (3, 2D, 2D)
    b_dec = jnp.stack([jnp.concatenate([bp(n), bp(n)])
                       for n in ("dec1", "dec2", "dec3")])[..., None]              # (3, 2D, 1)

    grid = (num_tiles,)
    lane_spec = lambda rows: pl.BlockSpec((rows, tile), lambda i: (0, i))
    full = lambda a: pl.BlockSpec(a.shape, lambda i, nd=a.ndim: (0,) * nd)

    in_itemsize = jnp.dtype(cd).itemsize
    out_itemsize = jnp.dtype(out_dtype).itemsize
    flops = int(2 * n_pad * (3 * D * D + 3 * D * D + D * D + 3 * (2 * D) * (2 * D)))
    bytes_accessed = int(n_pad * (D * in_itemsize + 5 * D * out_itemsize)
                         + (19 * D * D) * in_itemsize + 13 * D * 4)

    # VMEM budget: 2x in block + 2x out block + ~12 (D, tile) f32 temporaries.
    per_step = (2 * D * tile * in_itemsize + 2 * 5 * D * tile * out_itemsize
                + 12 * D * tile * 4 + (1 << 20))
    # Default tile (<=4096) stays well under the 32 MiB scoped default everywhere
    # (and under v7x's 64 MiB physical VMEM); only raise the limit if a user tile
    # actually needs it.  On v7x keep tile_n <= 8192 so this stays < 64 MiB.
    vmem_limit = None if per_step <= (30 << 20) else min(per_step + (8 << 20), 120 << 20)

    kernel = functools.partial(_fused_vae_kernel, act_dtype=act_dtype)

    packed = pl.pallas_call(
        kernel,
        out_shape=jax.ShapeDtypeStruct((5 * D, n_pad), out_dtype),
        grid_spec=pltpu.PrefetchScalarGridSpec(
            num_scalar_prefetch=0,
            grid=grid,
            in_specs=[lane_spec(D),
                      full(w_enc), full(b_enc),
                      full(w_heads), full(b_heads),
                      full(w_zi), full(b_zi),
                      full(w_dec), full(b_dec)],
            out_specs=lane_spec(5 * D),
        ),
        compiler_params=pltpu.CompilerParams(
            dimension_semantics=("parallel",),
            vmem_limit_bytes=vmem_limit),
        cost_estimate=pl.CostEstimate(flops=flops, transcendentals=0,
                                      bytes_accessed=bytes_accessed),
    )(x_t, w_enc, b_enc, w_heads, b_heads, w_zi, b_zi, w_dec, b_dec)

    y_mean_prior, y_logvar_prior = _prior(params, B)

    # One fused relayout back to the module's (N, feature) convention (the five
    # separate .T ops of the previous version collapse into this single op;
    # out_dtype=bfloat16 halves its traffic, and deployments that can consume
    # the packed (5D, N) layout directly can skip it entirely).
    out_rows = packed.T[:N]                     # (N, 5D)
    yt_mean = out_rows[:, 0:D]
    yt_logvar = out_rows[:, D:2 * D]
    yt_int = out_rows[:, 2 * D:3 * D]
    recon_xt = out_rows[:, 3 * D:4 * D]
    recon_xt_ = out_rows[:, 4 * D:5 * D]

    # Eval mode: reparameterize(mean, logvar, random_sampling=False) == mean.
    return (yt_mean, yt_logvar, yt_mean, yt_int,
            y_mean_prior, y_logvar_prior, recon_xt, recon_xt_)


# ---------------------------------------------------------------------------
# Pure-JAX reference for correctness checking (mirrors the kernel's precision
# policy; with compute_dtype=float32 this is exact PyTorch-eval math).
# ---------------------------------------------------------------------------
def reference_forward(xt, xt_, params, compute_dtype=jnp.bfloat16, act_dtype=None,
                      out_dtype=jnp.float32):
    del xt_
    act_dtype = compute_dtype if act_dtype is None else act_dtype
    B = xt.shape[0]
    x = xt.reshape(-1, INPUT_DIM).astype(compute_dtype)

    def cast(h, dt):
        return h if h.dtype == dt else h.astype(dt)

    def leaky(a, s):
        return jnp.where(a >= 0, a, s * a)

    def lin_f32(h, name):
        w = params[name + "_w"].astype(compute_dtype)
        return jnp.dot(cast(h, compute_dtype), w.T,
                       preferred_element_type=jnp.float32) + params[name + "_b"]

    def linact(h, name, slope):
        w = params[name + "_w"].astype(compute_dtype)
        acc = jnp.dot(cast(h, compute_dtype), w.T, preferred_element_type=jnp.float32)
        b = params[name + "_b"].astype(act_dtype)
        return leaky(cast(acc, act_dtype) + b, slope)

    h = linact(x, "enc1", NEG_SLOPE)
    h = linact(h, "enc2", NEG_SLOPE)
    yt0 = lin_f32(h, "enc3")

    mean = lin_f32(yt0, "zmean")
    logvar = lin_f32(yt0, "zlogvar")
    yti = leaky(cast(lin_f32(yt0, "zinter"), act_dtype), NEG_SLOPE)
    yti = linact(yti, "zinter", NEG_SLOPE)

    def dec(z):
        d = linact(z, "dec1", DEC_SLOPE)
        d = linact(d, "dec2", DEC_SLOPE)
        return lin_f32(d, "dec3")

    recon_xt = dec(cast(mean, act_dtype))
    recon_xt_ = dec(yti)

    y_mean_prior, y_logvar_prior = _prior(params, B)
    od = out_dtype
    return (mean.astype(od), logvar.astype(od), mean.astype(od), yti.astype(od),
            y_mean_prior, y_logvar_prior,
            recon_xt.reshape(-1, INPUT_DIM).astype(od),
            recon_xt_.reshape(-1, INPUT_DIM).astype(od))


if __name__ == "__main__":
    key = jax.random.PRNGKey(0)
    kx, kx2 = jax.random.split(key)
    B, T = 4, 8
    xt = jax.random.normal(kx, (B, T, INPUT_DIM), jnp.float32)
    xt_ = jax.random.normal(kx2, (B, T, INPUT_DIM), jnp.float32)

    params = init_params(jax.random.PRNGKey(42))

    # 1) Tight correctness check: f32 MXU inputs, f32 elementwise, f32 outputs.
    outs32 = jax.block_until_ready(
        temporal_vae_forward(xt, xt_, params, compute_dtype=jnp.float32))
    refs32 = reference_forward(xt, xt_, params, compute_dtype=jnp.float32)
    for o, r in zip(outs32, refs32):
        assert o.shape == r.shape and o.dtype == r.dtype
        assert jnp.allclose(o, r, atol=5e-4, rtol=5e-4)

    # 2) Default perf mode: bf16 MXU + bf16 elementwise, f32 outputs.
    outs = jax.block_until_ready(temporal_vae_forward(xt, xt_, params))
    refs = reference_forward(xt, xt_, params)
    for o, r in zip(outs, refs):
        assert o.shape == r.shape and o.dtype == r.dtype
        assert jnp.allclose(o, r, atol=3e-2, rtol=3e-2)

    # 3) bf16 outputs (halves writeback + relayout; the v5e-targeted option).
    outs_b = jax.block_until_ready(
        temporal_vae_forward(xt, xt_, params, out_dtype=jnp.bfloat16))
    for o, r in zip(outs_b, refs):
        assert o.shape == r.shape
        assert jnp.allclose(o.astype(jnp.float32), jnp.asarray(r, jnp.float32),
                            atol=5e-2, rtol=5e-2)

    print("KERNEL_OK")
</pallas_src>

<mosaic_0001>
module attributes {stable_mosaic.version = 11 : i64} {
  func.func @_fused_vae_kernel(%arg0: i32, %arg1: memref<32x128xf32, #tpu.memory_space<vmem>>, %arg2: memref<3x32x32xf32, #tpu.memory_space<vmem>>, %arg3: memref<3x32x1xf32, #tpu.memory_space<vmem>>, %arg4: memref<96x32xf32, #tpu.memory_space<vmem>>, %arg5: memref<96x1xf32, #tpu.memory_space<vmem>>, %arg6: memref<32x32xf32, #tpu.memory_space<vmem>>, %arg7: memref<32x1xf32, #tpu.memory_space<vmem>>, %arg8: memref<3x64x64xf32, #tpu.memory_space<vmem>>, %arg9: memref<3x64x1xf32, #tpu.memory_space<vmem>>, %arg10: memref<160x128xf32, #tpu.memory_space<vmem>>) attributes {dimension_semantics = [#tpu.dimension_semantics<parallel>], iteration_bounds = array<i64: 1>, scalar_prefetch = 0 : i64, scratch_operands = 0 : i64, tpu.core_type = #tpu.core_type<tc>, window_params = [{transform_indices = @transform_0, window_bounds = array<i64: 32, 128>}, {pipeline_mode = #tpu.pipeline_mode<synchronous>, transform_indices = @transform_1, window_bounds = array<i64: 3, 32, 32>}, {pipeline_mode = #tpu.pipeline_mode<synchronous>, transform_indices = @transform_2, window_bounds = array<i64: 3, 32, 1>}, {pipeline_mode = #tpu.pipeline_mode<synchronous>, transform_indices = @transform_3, window_bounds = array<i64: 96, 32>}, {pipeline_mode = #tpu.pipeline_mode<synchronous>, transform_indices = @transform_4, window_bounds = array<i64: 96, 1>}, {pipeline_mode = #tpu.pipeline_mode<synchronous>, transform_indices = @transform_5, window_bounds = array<i64: 32, 32>}, {pipeline_mode = #tpu.pipeline_mode<synchronous>, transform_indices = @transform_6, window_bounds = array<i64: 32, 1>}, {pipeline_mode = #tpu.pipeline_mode<synchronous>, transform_indices = @transform_7, window_bounds = array<i64: 3, 64, 64>}, {pipeline_mode = #tpu.pipeline_mode<synchronous>, transform_indices = @transform_8, window_bounds = array<i64: 3, 64, 1>}, {transform_indices = @transform_9, window_bounds = array<i64: 160, 128>}]} {
    %c0 = arith.constant 0 : index
    %c0_0 = arith.constant 0 : index
    %0 = vector.load %arg1[%c0, %c0_0] : memref<32x128xf32, #tpu.memory_space<vmem>>, vector<32x128xf32>
    %c0_1 = arith.constant 0 : index
    %c0_2 = arith.constant 0 : index
    %c0_3 = arith.constant 0 : index
    %1 = vector.load %arg2[%c0_1, %c0_2, %c0_3] : memref<3x32x32xf32, #tpu.memory_space<vmem>>, vector<1x32x32xf32>
    %2 = vector.shape_cast %1 : vector<1x32x32xf32> to vector<32x32xf32>
    %c0_4 = arith.constant 0 : index
    %c0_5 = arith.constant 0 : index
    %c0_6 = arith.constant 0 : index
    %3 = vector.load %arg3[%c0_4, %c0_5, %c0_6] : memref<3x32x1xf32, #tpu.memory_space<vmem>>, vector<1x32x1xf32>
    %4 = vector.shape_cast %3 : vector<1x32x1xf32> to vector<32x1xf32>
    %cst = arith.constant dense<0.000000e+00> : vector<32x128xf32>
    %5 = tpu.matmul %2, %0, %cst {dimension_numbers = #tpu.dot_dimension_numbers<[1], [0], [0], [1], [0, 0, 1, 1], [], []>} : vector<32x32xf32>, vector<32x128xf32>, vector<32x128xf32> -> vector<32x128xf32>
    %6 = vector.broadcast %4 : vector<32x1xf32> to vector<32x128xf32>
    %7 = arith.addf %5, %6 : vector<32x128xf32>
    %cst_7 = arith.constant 0.000000e+00 : f32
    %8 = vector.broadcast %cst_7 : f32 to vector<32x128xf32>
    %9 = arith.cmpf oge, %7, %8 : vector<32x128xf32>
    %cst_8 = arith.constant 2.000000e-01 : f32
    %10 = vector.broadcast %cst_8 : f32 to vector<32x128xf32>
    %11 = arith.mulf %10, %7 : vector<32x128xf32>
    %12 = arith.select %9, %7, %11 : vector<32x128xi1>, vector<32x128xf32>
    %c1 = arith.constant 1 : index
    %c0_9 = arith.constant 0 : index
    %c0_10 = arith.constant 0 : index
    %13 = vector.load %arg2[%c1, %c0_9, %c0_10] : memref<3x32x32xf32, #tpu.memory_space<vmem>>, vector<1x32x32xf32>
    %14 = vector.shape_cast %13 : vector<1x32x32xf32> to vector<32x32xf32>
    %c1_11 = arith.constant 1 : index
    %c0_12 = arith.constant 0 : index
    %c0_13 = arith.constant 0 : index
    %15 = vector.load %arg3[%c1_11, %c0_12, %c0_13] : memref<3x32x1xf32, #tpu.memory_space<vmem>>, vector<1x32x1xf32>
    %16 = vector.shape_cast %15 : vector<1x32x1xf32> to vector<32x1xf32>
    %cst_14 = arith.constant dense<0.000000e+00> : vector<32x128xf32>
    %17 = tpu.matmul %14, %12, %cst_14 {dimension_numbers = #tpu.dot_dimension_numbers<[1], [0], [0], [1], [0, 0, 1, 1], [], []>} : vector<32x32xf32>, vector<32x128xf32>, vector<32x128xf32> -> vector<32x128xf32>
    %18 = vector.broadcast %16 : vector<32x1xf32> to vector<32x128xf32>
    %19 = arith.addf %17, %18 : vector<32x128xf32>
    %cst_15 = arith.constant 0.000000e+00 : f32
    %20 = vector.broadcast %cst_15 : f32 to vector<32x128xf32>
    %21 = arith.cmpf oge, %19, %20 : vector<32x128xf32>
    %cst_16 = arith.constant 2.000000e-01 : f32
    %22 = vector.broadcast %cst_16 : f32 to vector<32x128xf32>
    %23 = arith.mulf %22, %19 : vector<32x128xf32>
    %24 = arith.select %21, %19, %23 : vector<32x128xi1>, vector<32x128xf32>
    %c2 = arith.constant 2 : index
    %c0_17 = arith.constant 0 : index
    %c0_18 = arith.constant 0 : index
    %25 = vector.load %arg2[%c2, %c0_17, %c0_18] : memref<3x32x32xf32, #tpu.memory_space<vmem>>, vector<1x32x32xf32>
    %26 = vector.shape_cast %25 : vector<1x32x32xf32> to vector<32x32xf32>
    %c2_19 = arith.constant 2 : index
    %c0_20 = arith.constant 0 : index
    %c0_21 = arith.constant 0 : index
    %27 = vector.load %arg3[%c2_19, %c0_20, %c0_21] : memref<3x32x1xf32, #tpu.memory_space<vmem>>, vector<1x32x1xf32>
    %28 = vector.shape_cast %27 : vector<1x32x1xf32> to vector<32x1xf32>
    %cst_22 = arith.constant dense<0.000000e+00> : vector<32x128xf32>
    %29 = tpu.matmul %26, %24, %cst_22 {dimension_numbers = #tpu.dot_dimension_numbers<[1], [0], [0], [1], [0, 0, 1, 1], [], []>} : vector<32x32xf32>, vector<32x128xf32>, vector<32x128xf32> -> vector<32x128xf32>
    %30 = vector.broadcast %28 : vector<32x1xf32> to vector<32x128xf32>
    %31 = arith.addf %29, %30 : vector<32x128xf32>
    %c0_23 = arith.constant 0 : index
    %c0_24 = arith.constant 0 : index
    %32 = vector.load %arg4[%c0_23, %c0_24] : memref<96x32xf32, #tpu.memory_space<vmem>>, vector<96x32xf32>
    %c0_25 = arith.constant 0 : index
    %c0_26 = arith.constant 0 : index
    %33 = vector.load %arg5[%c0_25, %c0_26] : memref<96x1xf32, #tpu.memory_space<vmem>>, vector<96x1xf32>
    %cst_27 = arith.constant dense<0.000000e+00> : vector<96x128xf32>
    %34 = tpu.matmul %32, %31, %cst_27 {dimension_numbers = #tpu.dot_dimension_numbers<[1], [0], [0], [1], [0, 0, 1, 1], [], []>} : vector<96x32xf32>, vector<32x128xf32>, vector<96x128xf32> -> vector<96x128xf32>
    %35 = vector.broadcast %33 : vector<96x1xf32> to vector<96x128xf32>
    %36 = arith.addf %34, %35 : vector<96x128xf32>
    %37 = vector.extract_strided_slice %36 {offsets = [0, 0], sizes = [32, 128], strides = [1, 1]} : vector<96x128xf32> to vector<32x128xf32>
    %38 = vector.extract_strided_slice %36 {offsets = [32, 0], sizes = [32, 128], strides = [1, 1]} : vector<96x128xf32> to vector<32x128xf32>
    %39 = vector.extract_strided_slice %36 {offsets = [64, 0], sizes = [32, 128], strides = [1, 1]} : vector<96x128xf32> to vector<32x128xf32>
    %cst_28 = arith.constant 0.000000e+00 : f32
    %40 = vector.broadcast %cst_28 : f32 to vector<32x128xf32>
    %41 = arith.cmpf oge, %39, %40 : vector<32x128xf32>
    %cst_29 = arith.constant 2.000000e-01 : f32
    %42 = vector.broadcast %cst_29 : f32 to vector<32x128xf32>
    %43 = arith.mulf %42, %39 : vector<32x128xf32>
    %44 = arith.select %41, %39, %43 : vector<32x128xi1>, vector<32x128xf32>
    %c0_30 = arith.constant 0 : index
    %c0_31 = arith.constant 0 : index
    %45 = vector.load %arg6[%c0_30, %c0_31] : memref<32x32xf32, #tpu.memory_space<vmem>>, vector<32x32xf32>
    %c0_32 = arith.constant 0 : index
    %c0_33 = arith.constant 0 : index
    %46 = vector.load %arg7[%c0_32, %c0_33] : memref<32x1xf32, #tpu.memory_space<vmem>>, vector<32x1xf32>
    %cst_34 = arith.constant dense<0.000000e+00> : vector<32x128xf32>
    %47 = tpu.matmul %45, %44, %cst_34 {dimension_numbers = #tpu.dot_dimension_numbers<[1], [0], [0], [1], [0, 0, 1, 1], [], []>} : vector<32x32xf32>, vector<32x128xf32>, vector<32x128xf32> -> vector<32x128xf32>
    %48 = vector.broadcast %46 : vector<32x1xf32> to vector<32x128xf32>
    %49 = arith.addf %47, %48 : vector<32x128xf32>
    %cst_35 = arith.constant 0.000000e+00 : f32
    %50 = vector.broadcast %cst_35 : f32 to vector<32x128xf32>
    %51 = arith.cmpf oge, %49, %50 : vector<32x128xf32>
    %cst_36 = arith.constant 2.000000e-01 : f32
    %52 = vector.broadcast %cst_36 : f32 to vector<32x128xf32>
    %53 = arith.mulf %52, %49 : vector<32x128xf32>
    %54 = arith.select %51, %49, %53 : vector<32x128xi1>, vector<32x128xf32>
    %55 = tpu.concatenate %37, %54 in 0 : vector<32x128xf32>, vector<32x128xf32> -> vector<64x128xf32>
    %c0_37 = arith.constant 0 : index
    %c0_38 = arith.constant 0 : index
    %c0_39 = arith.constant 0 : index
    %56 = vector.load %arg8[%c0_37, %c0_38, %c0_39] : memref<3x64x64xf32, #tpu.memory_space<vmem>>, vector<1x64x64xf32>
    %57 = vector.shape_cast %56 : vector<1x64x64xf32> to vector<64x64xf32>
    %c0_40 = arith.constant 0 : index
    %c0_41 = arith.constant 0 : index
    %c0_42 = arith.constant 0 : index
    %58 = vector.load %arg9[%c0_40, %c0_41, %c0_42] : memref<3x64x1xf32, #tpu.memory_space<vmem>>, vector<1x64x1xf32>
    %59 = vector.shape_cast %58 : vector<1x64x1xf32> to vector<64x1xf32>
    %cst_43 = arith.constant dense<0.000000e+00> : vector<64x128xf32>
    %60 = tpu.matmul %57, %55, %cst_43 {dimension_numbers = #tpu.dot_dimension_numbers<[1], [0], [0], [1], [0, 0, 1, 1], [], []>} : vector<64x64xf32>, vector<64x128xf32>, vector<64x128xf32> -> vector<64x128xf32>
    %61 = vector.broadcast %59 : vector<64x1xf32> to vector<64x128xf32>
    %62 = arith.addf %60, %61 : vector<64x128xf32>
    %cst_44 = arith.constant 0.000000e+00 : f32
    %63 = vector.broadcast %cst_44 : f32 to vector<64x128xf32>
    %64 = arith.cmpf oge, %62, %63 : vector<64x128xf32>
    %cst_45 = arith.constant 5.000000e+00 : f32
    %65 = vector.broadcast %cst_45 : f32 to vector<64x128xf32>
    %66 = arith.mulf %65, %62 : vector<64x128xf32>
    %67 = arith.select %64, %62, %66 : vector<64x128xi1>, vector<64x128xf32>
    %c1_46 = arith.constant 1 : index
    %c0_47 = arith.constant 0 : index
    %c0_48 = arith.constant 0 : index
    %68 = vector.load %arg8[%c1_46, %c0_47, %c0_48] : memref<3x64x64xf32, #tpu.memory_space<vmem>>, vector<1x64x64xf32>
    %69 = vector.shape_cast %68 : vector<1x64x64xf32> to vector<64x64xf32>
    %c1_49 = arith.constant 1 : index
    %c0_50 = arith.constant 0 : index
    %c0_51 = arith.constant 0 : index
    %70 = vector.load %arg9[%c1_49, %c0_50, %c0_51] : memref<3x64x1xf32, #tpu.memory_space<vmem>>, vector<1x64x1xf32>
    %71 = vector.shape_cast %70 : vector<1x64x1xf32> to vector<64x1xf32>
    %cst_52 = arith.constant dense<0.000000e+00> : vector<64x128xf32>
    %72 = tpu.matmul %69, %67, %cst_52 {dimension_numbers = #tpu.dot_dimension_numbers<[1], [0], [0], [1], [0, 0, 1, 1], [], []>} : vector<64x64xf32>, vector<64x128xf32>, vector<64x128xf32> -> vector<64x128xf32>
    %73 = vector.broadcast %71 : vector<64x1xf32> to vector<64x128xf32>
    %74 = arith.addf %72, %73 : vector<64x128xf32>
    %cst_53 = arith.constant 0.000000e+00 : f32
    %75 = vector.broadcast %cst_53 : f32 to vector<64x128xf32>
    %76 = arith.cmpf oge, %74, %75 : vector<64x128xf32>
    %cst_54 = arith.constant 5.000000e+00 : f32
    %77 = vector.broadcast %cst_54 : f32 to vector<64x128xf32>
    %78 = arith.mulf %77, %74 : vector<64x128xf32>
    %79 = arith.select %76, %74, %78 : vector<64x128xi1>, vector<64x128xf32>
    %c2_55 = arith.constant 2 : index
    %c0_56 = arith.constant 0 : index
    %c0_57 = arith.constant 0 : index
    %80 = vector.load %arg8[%c2_55, %c0_56, %c0_57] : memref<3x64x64xf32, #tpu.memory_space<vmem>>, vector<1x64x64xf32>
    %81 = vector.shape_cast %80 : vector<1x64x64xf32> to vector<64x64xf32>
    %c2_58 = arith.constant 2 : index
    %c0_59 = arith.constant 0 : index
    %c0_60 = arith.constant 0 : index
    %82 = vector.load %arg9[%c2_58, %c0_59, %c0_60] : memref<3x64x1xf32, #tpu.memory_space<vmem>>, vector<1x64x1xf32>
    %83 = vector.shape_cast %82 : vector<1x64x1xf32> to vector<64x1xf32>
    %cst_61 = arith.constant dense<0.000000e+00> : vector<64x128xf32>
    %84 = tpu.matmul %81, %79, %cst_61 {dimension_numbers = #tpu.dot_dimension_numbers<[1], [0], [0], [1], [0, 0, 1, 1], [], []>} : vector<64x64xf32>, vector<64x128xf32>, vector<64x128xf32> -> vector<64x128xf32>
    %85 = vector.broadcast %83 : vector<64x1xf32> to vector<64x128xf32>
    %86 = arith.addf %84, %85 : vector<64x128xf32>
    %c0_62 = arith.constant 0 : index
    %c0_63 = arith.constant 0 : index
    %87 = vector.load %arg10[%c0_62, %c0_63] : memref<160x128xf32, #tpu.memory_space<vmem>>, vector<32x128xf32>
    tpu.vector_store %arg10[%c0_62, %c0_63], %37 {strides = array<i32>} : memref<160x128xf32, #tpu.memory_space<vmem>>, vector<32x128xf32>,
    %c32 = arith.constant 32 : index
    %c0_64 = arith.constant 0 : index
    %88 = vector.load %arg10[%c32, %c0_64] : memref<160x128xf32, #tpu.memory_space<vmem>>, vector<32x128xf32>
    tpu.vector_store %arg10[%c32, %c0_64], %38 {strides = array<i32>} : memref<160x128xf32, #tpu.memory_space<vmem>>, vector<32x128xf32>,
    %c64 = arith.constant 64 : index
    %c0_65 = arith.constant 0 : index
    %89 = vector.load %arg10[%c64, %c0_65] : memref<160x128xf32, #tpu.memory_space<vmem>>, vector<32x128xf32>
    tpu.vector_store %arg10[%c64, %c0_65], %54 {strides = array<i32>} : memref<160x128xf32, #tpu.memory_space<vmem>>, vector<32x128xf32>,
    %c96 = arith.constant 96 : index
    %c0_66 = arith.constant 0 : index
    %90 = vector.load %arg10[%c96, %c0_66] : memref<160x128xf32, #tpu.memory_space<vmem>>, vector<64x128xf32>
    tpu.vector_store %arg10[%c96, %c0_66], %86 {strides = array<i32>} : memref<160x128xf32, #tpu.memory_space<vmem>>, vector<64x128xf32>,
    return
  }
  func.func @transform_0(%arg0: i32) -> (i32, i32) {
    %c0_i32 = arith.constant 0 : i32
    %c0_i32_0 = arith.constant 0 : i32
    return %c0_i32, %arg0 : i32, i32
  }
  func.func @transform_1(%arg0: i32) -> (i32, i32, i32) {
    %c0_i32 = arith.constant 0 : i32
    %c0_i32_0 = arith.constant 0 : i32
    %c0_i32_1 = arith.constant 0 : i32
    %c0_i32_2 = arith.constant 0 : i32
    return %c0_i32, %c0_i32_0, %c0_i32_1 : i32, i32, i32
  }
  func.func @transform_2(%arg0: i32) -> (i32, i32, i32) {
    %c0_i32 = arith.constant 0 : i32
    %c0_i32_0 = arith.constant 0 : i32
    %c0_i32_1 = arith.constant 0 : i32
    %c0_i32_2 = arith.constant 0 : i32
    return %c0_i32, %c0_i32_0, %c0_i32_1 : i32, i32, i32
  }
  func.func @transform_3(%arg0: i32) -> (i32, i32) {
    %c0_i32 = arith.constant 0 : i32
    %c0_i32_0 = arith.constant 0 : i32
    %c0_i32_1 = arith.constant 0 : i32
    return %c0_i32, %c0_i32_0 : i32, i32
  }
  func.func @transform_4(%arg0: i32) -> (i32, i32) {
    %c0_i32 = arith.constant 0 : i32
    %c0_i32_0 = arith.constant 0 : i32
    %c0_i32_1 = arith.constant 0 : i32
    return %c0_i32, %c0_i32_0 : i32, i32
  }
  func.func @transform_5(%arg0: i32) -> (i32, i32) {
    %c0_i32 = arith.constant 0 : i32
    %c0_i32_0 = arith.constant 0 : i32
    %c0_i32_1 = arith.constant 0 : i32
    return %c0_i32, %c0_i32_0 : i32, i32
  }
  func.func @transform_6(%arg0: i32) -> (i32, i32) {
    %c0_i32 = arith.constant 0 : i32
    %c0_i32_0 = arith.constant 0 : i32
    %c0_i32_1 = arith.constant 0 : i32
    return %c0_i32, %c0_i32_0 : i32, i32
  }
  func.func @transform_7(%arg0: i32) -> (i32, i32, i32) {
    %c0_i32 = arith.constant 0 : i32
    %c0_i32_0 = arith.constant 0 : i32
    %c0_i32_1 = arith.constant 0 : i32
    %c0_i32_2 = arith.constant 0 : i32
    return %c0_i32, %c0_i32_0, %c0_i32_1 : i32, i32, i32
  }
  func.func @transform_8(%arg0: i32) -> (i32, i32, i32) {
    %c0_i32 = arith.constant 0 : i32
    %c0_i32_0 = arith.constant 0 : i32
    %c0_i32_1 = arith.constant 0 : i32
    %c0_i32_2 = arith.constant 0 : i32
    return %c0_i32, %c0_i32_0, %c0_i32_1 : i32, i32, i32
  }
  func.func @transform_9(%arg0: i32) -> (i32, i32) {
    %c0_i32 = arith.constant 0 : i32
    %c0_i32_0 = arith.constant 0 : i32
    return %c0_i32, %arg0 : i32, i32
  }
}

</mosaic_0001>

<bundles_post_ra>
// kernel: tpu_custom_call.1
= control target key start
LH: loop header
LB: loop body
LE: loop exit
PB: predicated region body
PF: predicated region fallthrough
CT: control target
= control target key end

     0   :  { %v1959_v3 = vmov 0   ;;  %vm65_vm0 = vcmask 261120   ;;  %s2467_s0 = inlined_call_operand.vmem [shape: f32[32,128], index: 0, kind: input, shape index: {}]   ;;  %s2468_s1 = inlined_call_operand.vmem [shape: f32[3,32,32], index: 1, kind: input, shape index: {}]   ;;  %s2469_s2 = inlined_call_operand.vmem [shape: f32[3,32,1], index: 2, kind: input, shape index: {}]   ;;  %s2470_s3 = inlined_call_operand.vmem [shape: f32[96,32], index: 3, kind: input, shape index: {}]   ;;  %s2471_s4 = inlined_call_operand.vmem [shape: f32[96,1], index: 4, kind: input, shape index: {}]   ;;  %s2472_s5 = inlined_call_operand.vmem [shape: f32[32,32], index: 5, kind: input, shape index: {}]   ;;  %s2473_s6 = inlined_call_operand.vmem [shape: f32[32,1], index: 6, kind: input, shape index: {}]   ;;  %s2474_s7 = inlined_call_operand.vmem [shape: f32[3,64,64], index: 7, kind: input, shape index: {}]   ;;  %s2475_s8 = inlined_call_operand.vmem [shape: f32[3,64,1], index: 8, kind: input, shape index: {}]   ;;  %s2476_s9 = inlined_call_operand.hbm [shape: f32[160,128], index: 9, kind: output, shape index: {}]  }
   0x1   :  { %v43_v0 = vld [vmem:[%s2469_s2 + $0x10] sm:$0xff]  ;;  %v41_v1 = vld [vmem:[%s2469_s2] sm:$0xff]  ;;  %1934 = vset.pattern.permute.xlu1 %v1959_v3  ;;  %1933 = vset.pattern.permute.xlu0 %v1959_v3  ;;  %v34_v4 = vld [vmem:[%s2467_s0 + $0x8] sm:$0xff] }
   0x2   :  { %v33_v2 = vld [vmem:[%s2467_s0] sm:$0xff]  ;;  %57 = vperm.xlu1 %1934, %v43_v0   ;;  %47 = vperm.xlu0 %1933, %v41_v1   ;;  %v35_v6 = vld [vmem:[%s2467_s0 + $0x10] sm:$0xff]  ;;  %v36_v7 = vld [vmem:[%s2467_s0 + $0x18] sm:$0xff] }
   0x3   :  { %v1841_v5 = vpack.c.bf16 %v34_v4, %v33_v2  ;;  %v44_v8 = vld [vmem:[%s2469_s2 + $0x18] sm:$0xff]  ;;  %v42_v9 = vld [vmem:[%s2469_s2 + $0x8] sm:$0xff]  ;;  %v1845_v10 = vpack.c.bf16 %v36_v7, %v35_v6  ;;  %v37_v11 = vld [vmem:[%s2468_s1] sm:$0xff] }
   0x4   :  { %1683 = vmatprep.mubr.msk.f32.mxu1 %vm65_vm0, %v37_v11  ;;  %v1488_v12 = vld [vmem:[%s2469_s2 + $0x28] sm:$0xff]  ;;  %v1487_v13 = vld [vmem:[%s2469_s2 + $0x20] sm:$0xff]  ;;  %v39_v15 = vld [vmem:[%s2468_s1 + $0x10] sm:$0xff] }
   0x5   :  { %1842 = vmatprep.subr.bf16.mxu1 %v1841_v5  ;;  %v38_v14 = vld [vmem:[%s2468_s1 + $0x8] sm:$0xff]  ;;  %v1490_v16 = vld [vmem:[%s2469_s2 + $0x38] sm:$0xff]  ;;  %v1489_v17 = vld [vmem:[%s2469_s2 + $0x30] sm:$0xff] }
   0x6   :  { %1844 = vmatpush3.bf16.msra.mxu1 %v1841_v5  ;;  %62 = vperm.xlu1 %1934, %v44_v8   ;;  %v40_v18 = vld [vmem:[%s2468_s1 + $0x18] sm:$0xff]  ;;  %v1500_v19 = vld [vmem:[%s2469_s2 + $0x48] sm:$0xff]  ;;  %v1499_v20 = vld [vmem:[%s2469_s2 + $0x40] sm:$0xff] }
   0x7   :  { %52 = vperm.xlu0 %1933, %v42_v9   ;;  %1846 = vmatprep.subr.bf16.mxu1 %v1845_v10  ;;  %v1502_v21 = vld [vmem:[%s2469_s2 + $0x58] sm:$0xff]  ;;  %v1501_v22 = vld [vmem:[%s2469_s2 + $0x50] sm:$0xff] }
   0xa   :  { %1848 = vmatpush3.bf16.msra.mxu1 %v1845_v10  ;;  %192 = vperm.xlu1 %1934, %v1488_v12  }
   0xb   :  { %187 = vperm.xlu0 %1933, %v1487_v13  }
   0xd   :  { %1684 = vmatmul.mubr.msk.f32.vlgmr.msra.gmra.mrb[0].mxu1 %vm65_vm0, %v38_v14 }
   0xe   :  { %1686 = vmatprep.mubr.msk.f32.mxu1 %vm65_vm0, %v39_v15  ;;  %202 = vperm.xlu1 %1934, %v1490_v16  }
   0xf   :  { %197 = vperm.xlu0 %1933, %v1489_v17  }
  0x11   :  { %1687 = vmatmul.mubr.msk.f32.gmra.mrb[2].mxu1 %vm65_vm0, %v40_v18 }
  0x12   :  { %331 = vperm.xlu1 %1934, %v1500_v19  }
  0x13   :  { %326 = vperm.xlu0 %1933, %v1499_v20  }
  0x14   :  { %14 = vsyncpa [#allocation3], 0  ;;  %v462_v23 = vld [vmem:[%s2471_s4 + $0x48] sm:$0xff]  ;;  %v461_v24 = vld [vmem:[%s2471_s4 + $0x40] sm:$0xff]  ;;  %vm891_vm13 = vcmask 523264  }
  0x15   :  { %v464_v25 = vld [vmem:[%s2471_s4 + $0x58] sm:$0xff]  ;;  %v463_v26 = vld [vmem:[%s2471_s4 + $0x50] sm:$0xff]  ;;  %v454_v27 = vld [vmem:[%s2471_s4 + $0x8] sm:$0xff] }
  0x16   :  { %341 = vperm.xlu1 %1934, %v1502_v21   ;;  %v453_v28 = vld [vmem:[%s2471_s4] sm:$0xff]  ;;  %v456_v29 = vld [vmem:[%s2471_s4 + $0x18] sm:$0xff]  ;;  %v455_v30 = vld [vmem:[%s2471_s4 + $0x10] sm:$0xff] }
  0x17   :  { %336 = vperm.xlu0 %1933, %v1501_v22   ;;  %v703_v31 = vld [vmem:[%s2473_s6 + $0x8] sm:$0xff]  ;;  %v702_v32 = vld [vmem:[%s2473_s6] sm:$0xff]  ;;  %v705_v33 = vld [vmem:[%s2473_s6 + $0x18] sm:$0xff] }
  0x18   :  { %v704_v34 = vld [vmem:[%s2473_s6 + $0x10] sm:$0xff]  ;;  %v844_v35 = vld [vmem:[%s2475_s8 + $0x8] sm:$0xff]  ;;  %v843_v36 = vld [vmem:[%s2475_s8] sm:$0xff] }
  0x19   :  { %v846_v37 = vld [vmem:[%s2475_s8 + $0x18] sm:$0xff]  ;;  %v845_v38 = vld [vmem:[%s2475_s8 + $0x10] sm:$0xff]  ;;  %v848_v39 = vld [vmem:[%s2475_s8 + $0x28] sm:$0xff] }
  0x1a   :  { %512 = vperm.xlu1 %1934, %v462_v23   ;;  %v847_v40 = vld [vmem:[%s2475_s8 + $0x20] sm:$0xff]  ;;  %v850_v41 = vld [vmem:[%s2475_s8 + $0x38] sm:$0xff]  ;;  %v849_v42 = vld [vmem:[%s2475_s8 + $0x30] sm:$0xff] }
  0x1b   :  { %507 = vperm.xlu0 %1933, %v461_v24   ;;  %v1540_v43 = vld [vmem:[%s2475_s8 + $0x48] sm:$0xff]  ;;  %v1539_v44 = vld [vmem:[%s2475_s8 + $0x40] sm:$0xff]  ;;  %v1542_v45 = vld [vmem:[%s2475_s8 + $0x58] sm:$0xff] }
  0x1c   :  { %v1541_v46 = vld [vmem:[%s2475_s8 + $0x50] sm:$0xff]  ;;  %v1544_v47 = vld [vmem:[%s2475_s8 + $0x68] sm:$0xff]  ;;  %v1543_v48 = vld [vmem:[%s2475_s8 + $0x60] sm:$0xff] }
  0x1d   :  { %v1546_v49 = vld [vmem:[%s2475_s8 + $0x78] sm:$0xff]  ;;  %v1545_v50 = vld [vmem:[%s2475_s8 + $0x70] sm:$0xff]  ;;  %v458_v51 = vld [vmem:[%s2471_s4 + $0x28] sm:$0xff] }
  0x1e   :  { %522 = vperm.xlu1 %1934, %v464_v25   ;;  %v457_v52 = vld [vmem:[%s2471_s4 + $0x20] sm:$0xff]  ;;  %v460_v53 = vld [vmem:[%s2471_s4 + $0x38] sm:$0xff]  ;;  %v459_v54 = vld [vmem:[%s2471_s4 + $0x30] sm:$0xff] }
  0x1f   :  { %517 = vperm.xlu0 %1933, %v463_v26   ;;  %v1564_v55 = vld [vmem:[%s2475_s8 + $0x88] sm:$0xff]  ;;  %v1563_v56 = vld [vmem:[%s2475_s8 + $0x80] sm:$0xff]  ;;  %v1566_v57 = vld [vmem:[%s2475_s8 + $0x98] sm:$0xff] }
  0x20   :  { %v1565_v58 = vld [vmem:[%s2475_s8 + $0x90] sm:$0xff]  ;;  %v1568_v59 = vld [vmem:[%s2475_s8 + $0xa8] sm:$0xff]  ;;  %v1567_v60 = vld [vmem:[%s2475_s8 + $0xa0] sm:$0xff] }
  0x21   :  { %v1570_v61 = vld [vmem:[%s2475_s8 + $0xb8] sm:$0xff]  ;;  %v1569_v62 = vld [vmem:[%s2475_s8 + $0xb0] sm:$0xff]  ;;  %v1483_v63 = vld [vmem:[%s2468_s1 + $0x20] sm:$0xff] }
  0x22   :  { %472 = vperm.xlu1 %1934, %v454_v27   ;;  %1697 = vmatprep.mubr.msk.f32.mxu1 %vm65_vm0, %v1483_v63  ;;  %v1484_v22 = vld [vmem:[%s2468_s1 + $0x28] sm:$0xff]  ;;  %v1485_v23 = vld [vmem:[%s2468_s1 + $0x30] sm:$0xff]  ;;  %v1486_v24 = vld [vmem:[%s2468_s1 + $0x38] sm:$0xff] }
  0x23   :  { %467 = vperm.xlu0 %1933, %v453_v28   ;;  %v1495_v25 = vld [vmem:[%s2468_s1 + $0x40] sm:$0xff] }
  0x24   :  { %1711 = vmatprep.mubr.msk.f32.mxu0 %vm65_vm0, %v1495_v25 }
  0x26   :  { %482 = vperm.xlu1 %1934, %v456_v29  }
  0x27   :  { %477 = vperm.xlu0 %1933, %v455_v30  }
  0x2a   :  { %713 = vperm.xlu1 %1934, %v703_v31  }
  0x2b   :  { %708 = vperm.xlu0 %1933, %v702_v32  }
  0x2e   :  { %723 = vperm.xlu1 %1934, %v705_v33  }
  0x2f   :  { %718 = vperm.xlu0 %1933, %v704_v34  }
  0x32   :  { %858 = vperm.xlu1 %1934, %v844_v35  }
  0x33   :  { %853 = vperm.xlu0 %1933, %v843_v36  }
  0x36   :  { %868 = vperm.xlu1 %1934, %v846_v37  }
  0x37   :  { %863 = vperm.xlu0 %1933, %v845_v38  }
  0x3a   :  { %878 = vperm.xlu1 %1934, %v848_v39  }
  0x3b   :  { %873 = vperm.xlu0 %1933, %v847_v40  }
  0x3e   :  { %888 = vperm.xlu1 %1934, %v850_v41  }
  0x3f   :  { %883 = vperm.xlu0 %1933, %v849_v42  }
  0x42   :  { %1070 = vperm.xlu1 %1934, %v1540_v43  }
  0x43   :  { %1065 = vperm.xlu0 %1933, %v1539_v44  }
  0x46   :  { %1080 = vperm.xlu1 %1934, %v1542_v45  }
  0x47   :  { %1075 = vperm.xlu0 %1933, %v1541_v46  }
  0x4a   :  { %1090 = vperm.xlu1 %1934, %v1544_v47  }
  0x4b   :  { %1085 = vperm.xlu0 %1933, %v1543_v48   ;;  %v1496_v48 = vld [vmem:[%s2468_s1 + $0x48] sm:$0xff] }
  0x4e   :  { %1100 = vperm.xlu1 %1934, %v1546_v49   ;;  %v1497_v49 = vld [vmem:[%s2468_s1 + $0x50] sm:$0xff] }
  0x4f   :  { %1095 = vperm.xlu0 %1933, %v1545_v50   ;;  %v1498_v50 = vld [vmem:[%s2468_s1 + $0x58] sm:$0xff] }
  0x52   :  { %492 = vperm.xlu1 %1934, %v458_v51   ;;  %v441_v51 = vld [vmem:[%s2470_s3] sm:$0xff] }
  0x53   :  { %487 = vperm.xlu0 %1933, %v457_v52  }
  0x56   :  { %502 = vperm.xlu1 %1934, %v460_v53  }
  0x57   :  { %497 = vperm.xlu0 %1933, %v459_v54  }
  0x5a   :  { %1281 = vperm.xlu1 %1934, %v1564_v55  }
  0x5b   :  { %1276 = vperm.xlu0 %1933, %v1563_v56  }
  0x5e   :  { %1291 = vperm.xlu1 %1934, %v1566_v57  }
  0x5f   :  { %1286 = vperm.xlu0 %1933, %v1565_v58  }
  0x62   :  { %1301 = vperm.xlu1 %1934, %v1568_v59  }
  0x63   :  { %1296 = vperm.xlu0 %1933, %v1567_v60  }
  0x66   :  { %1311 = vperm.xlu1 %1934, %v1570_v61  }
  0x67   :  { %1306 = vperm.xlu0 %1933, %v1569_v62  }
  0x81   :  { %v48_v0 = vpop.permute.xlu0 %47  ;;  %v58_v1 = vpop.permute.xlu1 %57 }
  0x85   :  { %v63_v8 = vpop.permute.xlu1 %62 }
  0x86   :  { %v53_v2 = vpop.permute.xlu0 %52 }
  0x89   :  { %v193_v26 = vpop.permute.xlu1 %192 }
  0x8a   :  { %v188_v27 = vpop.permute.xlu0 %187 }
  0x8d   :  { %v203_v33 = vpop.permute.xlu1 %202 }
  0x8e   :  { %v198_v36 = vpop.permute.xlu0 %197 }
  0x91   :  { %v332_v52 = vpop.permute.xlu1 %331 }
  0x92   :  { %v327_v53 = vpop.permute.xlu0 %326 }
  0x95   :  { %v342_v58 = vpop.permute.xlu1 %341 }
  0x96   :  { %v337_v61 = vpop.permute.xlu0 %336 }
  0xe0   :  { %v1685_v3 = vpop.f32.mrb[0].mxu1 }
  0xe1   :  { %v150_v4 = vadd.f32 %v1685_v3, %v53_v2  ;;  %v144_v5 = vpop.f32.mrb[1].mxu1  ;;  %v442_v2 = vld [vmem:[%s2470_s3 + $0x8] sm:$0xff]  ;;  %v443_v3 = vld [vmem:[%s2470_s3 + $0x10] sm:$0xff] }
  0xe2   :  { %v145_v6 = vadd.f32 %v144_v5, %v48_v0  ;;  %v445_v5 = vld [vmem:[%s2470_s3 + $0x20] sm:$0xff] }
  0xe3   :  { %vm164_vm1 = vcmp.ge.f32.partialorder %v150_v4, 0.0  ;;  %v168_v7 = vmul.f32 0.2, %v150_v4 }
  0xe4   :  { %vm163_vm2 = vcmp.ge.f32.partialorder %v145_v6, 0.0  ;;  %v167_v9 = vmul.f32 0.2, %v145_v6  ;;  %v1688_v10 = vpop.f32.mrb[2].mxu1 }
  0xe5   :  { %v160_v11 = vadd.f32 %v1688_v10, %v63_v8  ;;  %v154_v12 = vpop.f32.mrb[3].mxu1  ;;  %v172_v13 = vsel %vm164_vm1, %v150_v4, %v168_v7  ;;  %v444_v4 = vld [vmem:[%s2470_s3 + $0x18] sm:$0xff]  ;;  %v447_v7 = vld [vmem:[%s2470_s3 + $0x30] sm:$0xff]  ;;  %v450_v10 = vld [vmem:[%s2470_s3 + $0x48] sm:$0xff] }
  0xe6   :  { %v155_v14 = vadd.f32 %v154_v12, %v58_v1  ;;  %v171_v15 = vsel %vm163_vm2, %v145_v6, %v167_v9  ;;  %v446_v6 = vld [vmem:[%s2470_s3 + $0x28] sm:$0xff]  ;;  %v448_v8 = vld [vmem:[%s2470_s3 + $0x38] sm:$0xff]  ;;  %v449_v9 = vld [vmem:[%s2470_s3 + $0x40] sm:$0xff] }
  0xe7   :  { %vm166_vm3 = vcmp.ge.f32.partialorder %v160_v11, 0.0  ;;  %v170_v16 = vmul.f32 0.2, %v160_v11  ;;  %v1849_v17 = vpack.c.bf16 %v172_v13, %v171_v15  ;;  %v452_v12 = vld [vmem:[%s2470_s3 + $0x58] sm:$0xff]  ;;  %v698_v13 = vld [vmem:[%s2472_s5] sm:$0xff]  ;;  %v508_v15 = vpop.permute.xlu0 %507 }
  0xe8   :  { %vm165_vm4 = vcmp.ge.f32.partialorder %v155_v14, 0.0  ;;  %v169_v18 = vmul.f32 0.2, %v155_v14 }
  0xe9   :  { %1850 = vmatprep.subr.bf16.mxu1 %v1849_v17  ;;  %v174_v19 = vsel %vm166_vm3, %v160_v11, %v170_v16  ;;  %v451_v11 = vld [vmem:[%s2470_s3 + $0x50] sm:$0xff] }
  0xea   :  { %1852 = vmatpush3.bf16.msra.mxu1 %v1849_v17  ;;  %v173_v20 = vsel %vm165_vm4, %v155_v14, %v169_v18  ;;  %v513_v14 = vpop.permute.xlu1 %512 }
  0xeb   :  { %v1853_v21 = vpack.c.bf16 %v174_v19, %v173_v20  ;;  %v2283_v17 = vpop.permute.xlu0 %517 }
  0xed   :  { %1854 = vmatprep.subr.bf16.mxu1 %v1853_v21 }
  0xee   :  { %1856 = vmatpush3.bf16.msra.mxu1 %v1853_v21  ;;  %v2281_v16 = vpop.permute.xlu1 %522 }
  0xef   :  { %v468_v19 = vpop.permute.xlu0 %467 }
  0xf1   :  { %1698 = vmatmul.mubr.msk.f32.vlgmr.msra.gmra.mrb[4].mxu1 %vm65_vm0, %v1484_v22 }
  0xf2   :  { %1700 = vmatprep.mubr.msk.f32.mxu1 %vm65_vm0, %v1485_v23  ;;  %v473_v18 = vpop.permute.xlu1 %472 }
  0xf3   :  { %v478_v21 = vpop.permute.xlu0 %477 }
  0xf5   :  { %1701 = vmatmul.mubr.msk.f32.gmra.mrb[6].mxu1 %vm65_vm0, %v1486_v24 }
  0xf6   :  { %1725 = vmatprep.mubr.msk.f32.mxu1 %vm65_vm0, %v441_v51  ;;  %v483_v20 = vpop.permute.xlu1 %482 }
  0xf7   :  { %v2287_v23 = vpop.permute.xlu0 %708 }
  0xfa   :  { %v2285_v22 = vpop.permute.xlu1 %713 }
  0xfb   :  { %v2291_v25 = vpop.permute.xlu0 %718 }
  0xfe   :  { %v2289_v24 = vpop.permute.xlu1 %723 }
 0x1c4   :  { %v1699_v28 = vpop.f32.mrb[4].mxu1 }
 0x1c5   :  { %v289_v29 = vadd.f32 %v1699_v28, %v193_v26  ;;  %v283_v30 = vpop.f32.mrb[5].mxu1  ;;  %v2293_v26 = vpop.permute.xlu1 %858 }
 0x1c6   :  { %v284_v31 = vadd.f32 %v283_v30, %v188_v27  ;;  %v2295_v27 = vpop.permute.xlu0 %853 }
 0x1c7   :  { %v307_v32 = vmul.f32 0.2, %v289_v29  ;;  %vm303_vm5 = vcmp.ge.f32.partialorder %v289_v29, 0.0 }
 0x1c8   :  { %v306_v34 = vmul.f32 0.2, %v284_v31  ;;  %v1702_v35 = vpop.f32.mrb[6].mxu1  ;;  %vm302_vm6 = vcmp.ge.f32.partialorder %v284_v31, 0.0 }
 0x1c9   :  { %v299_v37 = vadd.f32 %v1702_v35, %v203_v33  ;;  %v293_v38 = vpop.f32.mrb[7].mxu1  ;;  %v311_v39 = vsel %vm303_vm5, %v289_v29, %v307_v32  ;;  %v2297_v28 = vpop.permute.xlu1 %868 }
 0x1ca   :  { %v294_v40 = vadd.f32 %v293_v38, %v198_v36  ;;  %v310_v41 = vsel %vm302_vm6, %v284_v31, %v306_v34  ;;  %v2299_v29 = vpop.permute.xlu0 %863 }
 0x1cb   :  { %vm305_vm7 = vcmp.ge.f32.partialorder %v299_v37, 0.0  ;;  %v309_v42 = vmul.f32 0.2, %v299_v37  ;;  %v1857_v43 = vpack.c.bf16 %v311_v39, %v310_v41 }
 0x1cc   :  { %vm304_vm8 = vcmp.ge.f32.partialorder %v294_v40, 0.0  ;;  %v308_v44 = vmul.f32 0.2, %v294_v40 }
 0x1cd   :  { %1858 = vmatprep.subr.bf16.mxu0 %v1857_v43  ;;  %v313_v45 = vsel %vm305_vm7, %v299_v37, %v309_v42  ;;  %v2301_v30 = vpop.permute.xlu1 %878 }
 0x1ce   :  { %1860 = vmatpush3.bf16.msra.mxu0 %v1857_v43  ;;  %v312_v46 = vsel %vm304_vm8, %v294_v40, %v308_v44  ;;  %v2303_v31 = vpop.permute.xlu0 %873 }
 0x1cf   :  { %v1861_v47 = vpack.c.bf16 %v313_v45, %v312_v46 }
 0x1d1   :  { %1862 = vmatprep.subr.bf16.mxu0 %v1861_v47  ;;  %v2305_v32 = vpop.permute.xlu1 %888 }
 0x1d2   :  { %1864 = vmatpush3.bf16.msra.mxu0 %v1861_v47  ;;  %v2307_v33 = vpop.permute.xlu0 %883 }
 0x1d5   :  { %1712 = vmatmul.mubr.msk.f32.vlgmr.msra.gmra.mrb[0].mxu0 %vm65_vm0, %v1496_v48  ;;  %v2309_v34 = vpop.permute.xlu1 %1070 }
 0x1d6   :  { %1714 = vmatprep.mubr.msk.f32.mxu0 %vm65_vm0, %v1497_v49  ;;  %v2311_v35 = vpop.permute.xlu0 %1065 }
 0x1d9   :  { %1715 = vmatmul.mubr.msk.f32.gmra.mrb[2].mxu0 %vm65_vm0, %v1498_v50  ;;  %v2313_v36 = vpop.permute.xlu1 %1080 }
 0x1da   :  { %1751 = vmatprep.mubr.msk.f32.mxu0 %vm65_vm0, %v698_v13  ;;  %v2315_v37 = vpop.permute.xlu0 %1075 }
 0x1dd   :  { %v2317_v38 = vpop.permute.xlu1 %1090 }
 0x1de   :  { %v2319_v39 = vpop.permute.xlu0 %1085 }
 0x1e1   :  { %v2321_v40 = vpop.permute.xlu1 %1100 }
 0x1e2   :  { %v2323_v42 = vpop.permute.xlu0 %1095 }
 0x1e5   :  { %v493_v50 = vpop.permute.xlu1 %492 }
 0x2a8   :  { %v1713_v54 = vpop.f32.mrb[0].mxu0 }
 0x2a9   :  { %v428_v55 = vadd.f32 %v1713_v54, %v332_v52  ;;  %v422_v56 = vpop.f32.mrb[1].mxu0  ;;  %v488_v52 = vpop.permute.xlu0 %487 }
 0x2aa   :  { %v423_v57 = vadd.f32 %v422_v56, %v327_v53 }
 0x2ac   :  { %v1865_v59 = vpack.c.bf16 %v428_v55, %v423_v57  ;;  %v1716_v60 = vpop.f32.mrb[2].mxu0 }
 0x2ad   :  { %v438_v62 = vadd.f32 %v1716_v60, %v342_v58  ;;  %v432_v63 = vpop.f32.mrb[3].mxu0  ;;  %v503_v58 = vpop.permute.xlu1 %502 }
 0x2ae   :  { %v433_v0 = vadd.f32 %v432_v63, %v337_v61  ;;  %1866 = vmatprep.subr.bf16.mxu1 %v1865_v59  ;;  %v498_v60 = vpop.permute.xlu0 %497 }
 0x2af   :  { %1868 = vmatpush3.bf16.msra.mxu1 %v1865_v59 }
 0x2b0   :  { %v1869_v1 = vpack.c.bf16 %v438_v62, %v433_v0 }
 0x2b2   :  { %1870 = vmatprep.subr.bf16.mxu1 %v1869_v1 }
 0x2b3   :  { %1872 = vmatpush3.bf16.msra.mxu1 %v1869_v1 }
 0x2b6   :  { %1726 = vmatmul.mubr.msk.f32.vlgmr.msra.gmra.mrb[8].mxu1 %vm65_vm0, %v442_v2 }
 0x2b7   :  { %1728 = vmatprep.mubr.msk.f32.mxu1 %vm65_vm0, %v443_v3 }
 0x2ba   :  { %1729 = vmatmul.mubr.msk.f32.gmra.mrb[10].mxu1 %vm65_vm0, %v444_v4 }
 0x2bb   :  { %1731 = vmatprep.mubr.msk.f32.mxu1 %vm65_vm0, %v445_v5 }
 0x2be   :  { %1732 = vmatmul.mubr.msk.f32.gmra.mrb[12].mxu1 %vm65_vm0, %v446_v6 }
 0x2bf   :  { %1734 = vmatprep.mubr.msk.f32.mxu1 %vm65_vm0, %v447_v7 }
 0x2c2   :  { %1735 = vmatmul.mubr.msk.f32.gmra.mrb[14].mxu1 %vm65_vm0, %v448_v8 }
 0x2c3   :  { %1737 = vmatprep.mubr.msk.f32.mxu1 %vm65_vm0, %v449_v9 }
 0x2c6   :  { %1738 = vmatmul.mubr.msk.f32.gmra.mrb[16].mxu1 %vm65_vm0, %v450_v10 }
 0x2c7   :  { %1740 = vmatprep.mubr.msk.f32.mxu1 %vm65_vm0, %v451_v11 }
 0x2ca   :  { %1741 = vmatmul.mubr.msk.f32.gmra.mrb[18].mxu1 %vm65_vm0, %v452_v12 }
 0x389   :  { %v1727_v41 = vpop.f32.mrb[8].mxu1 }
 0x38a   :  { %v633_v43 = vadd.f32 %v1727_v41, %v473_v18  ;;  %v627_v44 = vpop.f32.mrb[9].mxu1 }
 0x38b   :  { %v628_v45 = vadd.f32 %v627_v44, %v468_v19 }
 0x38c   :  { %1444 = vst [vmem:[#allocation2 + $0x8] sm:$0xff] %v633_v43 }
 0x38d   :  { %v1881_v46 = vpack.c.bf16 %v633_v43, %v628_v45  ;;  %1443 = vst [vmem:[#allocation2] sm:$0xff] %v628_v45  ;;  %v1730_v47 = vpop.f32.mrb[10].mxu1 }
 0x38e   :  { %v643_v48 = vadd.f32 %v1730_v47, %v483_v20  ;;  %v637_v49 = vpop.f32.mrb[11].mxu1  ;;  %v701_v20 = vld [vmem:[%s2472_s5 + $0x18] sm:$0xff] }
 0x38f   :  { %v638_v51 = vadd.f32 %v637_v49, %v478_v21  ;;  %v835_v21 = vld [vmem:[%s2474_s7] sm:$0xff] }
 0x390   :  { %1446 = vst [vmem:[#allocation2 + $0x18] sm:$0xff] %v643_v48 }
 0x391   :  { %v1885_v53 = vpack.c.bf16 %v643_v48, %v638_v51  ;;  %1445 = vst [vmem:[#allocation2 + $0x10] sm:$0xff] %v638_v51  ;;  %v1733_v54 = vpop.f32.mrb[12].mxu1 }
 0x392   :  { %v653_v55 = vadd.f32 %v1733_v54, %v493_v50  ;;  %v647_v56 = vpop.f32.mrb[13].mxu1 }
 0x393   :  { %v648_v57 = vadd.f32 %v647_v56, %v488_v52 }
 0x394   :  { %1448 = vst [vmem:[#allocation2 + $0x28] sm:$0xff] %v653_v55 }
 0x395   :  { %1447 = vst [vmem:[#allocation2 + $0x20] sm:$0xff] %v648_v57  ;;  %v1736_v59 = vpop.f32.mrb[14].mxu1 }
 0x396   :  { %v663_v61 = vadd.f32 %v1736_v59, %v503_v58  ;;  %v657_v62 = vpop.f32.mrb[15].mxu1  ;;  %v838_v58 = vld [vmem:[%s2474_s7 + $0x18] sm:$0xff]  ;;  %v839_v59 = vld [vmem:[%s2474_s7 + $0x20] sm:$0xff] }
 0x397   :  { %v658_v63 = vadd.f32 %v657_v62, %v498_v60  ;;  %v840_v60 = vld [vmem:[%s2474_s7 + $0x28] sm:$0xff]  ;;  %v842_v62 = vld [vmem:[%s2474_s7 + $0x38] sm:$0xff] }
 0x398   :  { %1450 = vst [vmem:[#allocation2 + $0x38] sm:$0xff] %v663_v61  ;;  %v841_v61 = vld [vmem:[%s2474_s7 + $0x30] sm:$0xff] }
 0x399   :  { %1449 = vst [vmem:[#allocation2 + $0x30] sm:$0xff] %v658_v63  ;;  %v1739_v0 = vpop.f32.mrb[16].mxu1  ;;  %v1531_v63 = vld [vmem:[%s2474_s7 + $0x40] sm:$0xff] }
 0x39a   :  { %v673_v1 = vadd.f32 %v1739_v0, %v513_v14  ;;  %v667_v2 = vpop.f32.mrb[17].mxu1  ;;  %1801 = vmatprep.mubr.msk.f32.mxu1 %vm891_vm13, %v1531_v63 }
 0x39b   :  { %v668_v3 = vadd.f32 %v667_v2, %v508_v15 }
 0x39c   :  { %vm687_vm9 = vcmp.ge.f32.partialorder %v673_v1, 0.0  ;;  %v691_v4 = vmul.f32 0.2, %v673_v1 }
 0x39d   :  { %vm686_vm10 = vcmp.ge.f32.partialorder %v668_v3, 0.0  ;;  %v690_v5 = vmul.f32 0.2, %v668_v3  ;;  %v1742_v6 = vpop.f32.mrb[18].mxu1 }
 0x39e   :  { %v683_v7 = vadd.f32 %v1742_v6, %v2281_v16  ;;  %v677_v8 = vpop.f32.mrb[19].mxu1  ;;  %v695_v9 = vsel %vm687_vm9, %v673_v1, %v691_v4  ;;  %v699_v16 = vld [vmem:[%s2472_s5 + $0x8] sm:$0xff] }
 0x39f   :  { %v678_v10 = vadd.f32 %v677_v8, %v2283_v17  ;;  %v694_v11 = vsel %vm686_vm10, %v668_v3, %v690_v5  ;;  %v700_v17 = vld [vmem:[%s2472_s5 + $0x10] sm:$0xff] }
 0x3a0   :  { %vm689_vm11 = vcmp.ge.f32.partialorder %v683_v7, 0.0  ;;  %v693_v12 = vmul.f32 0.2, %v683_v7  ;;  %v1873_v13 = vpack.c.bf16 %v695_v9, %v694_v11 }
 0x3a1   :  { %vm688_vm12 = vcmp.ge.f32.partialorder %v678_v10, 0.0  ;;  %v692_v18 = vmul.f32 0.2, %v678_v10 }
 0x3a2   :  { %1874 = vmatprep.subr.bf16.mxu0 %v1873_v13  ;;  %v697_v14 = vsel %vm689_vm11, %v683_v7, %v693_v12 }
 0x3a3   :  { %1876 = vmatpush3.bf16.msra.mxu0 %v1873_v13  ;;  %v696_v15 = vsel %vm688_vm12, %v678_v10, %v692_v18 }
 0x3a4   :  { %v1877_v19 = vpack.c.bf16 %v697_v14, %v696_v15 }
 0x3a6   :  { %1878 = vmatprep.subr.bf16.mxu0 %v1877_v19 }
 0x3a7   :  { %1880 = vmatpush3.bf16.msra.mxu0 %v1877_v19 }
 0x3a8   :  { %1882 = vmatprep.subr.bf16.mxu0 %v1881_v46 }
 0x3aa   :  { %1752 = vmatmul.mubr.msk.f32.vlgmr.msra.gmra.mrb[4].mxu0 %vm65_vm0, %v699_v16 }
 0x3ab   :  { %1884 = vmatpush3.bf16.msra.mxu0 %v1881_v46  ;;  %1754 = vmatprep.mubr.msk.f32.mxu0 %vm65_vm0, %v700_v17 }
 0x3ac   :  { %1886 = vmatprep.subr.bf16.mxu0 %v1885_v53 }
 0x3ae   :  { %1755 = vmatmul.mubr.msk.f32.gmra.mrb[6].mxu0 %vm65_vm0, %v701_v20 }
 0x3af   :  { %1888 = vmatpush3.bf16.msra.mxu0 %v1885_v53  ;;  %1773 = vmatprep.mubr.msk.f32.mxu0 %vm891_vm13, %v835_v21 }
 0x47d   :  { %v1753_v41 = vpop.f32.mrb[4].mxu0 }
 0x47e   :  { %v810_v43 = vadd.f32 %v1753_v41, %v2285_v22  ;;  %v804_v44 = vpop.f32.mrb[5].mxu0 }
 0x47f   :  { %v805_v45 = vadd.f32 %v804_v44, %v2287_v23 }
 0x480   :  { %vm824_vm14 = vcmp.ge.f32.partialorder %v810_v43, 0.0  ;;  %v828_v46 = vmul.f32 0.2, %v810_v43 }
 0x481   :  { %vm823_vm15 = vcmp.ge.f32.partialorder %v805_v45, 0.0  ;;  %v827_v47 = vmul.f32 0.2, %v805_v45  ;;  %v1756_v48 = vpop.f32.mrb[6].mxu0 }
 0x482   :  { %v820_v49 = vadd.f32 %v1756_v48, %v2289_v24  ;;  %v814_v50 = vpop.f32.mrb[7].mxu0  ;;  %v832_v51 = vsel %vm824_vm14, %v810_v43, %v828_v46  ;;  %v836_v24 = vld [vmem:[%s2474_s7 + $0x8] sm:$0xff] }
 0x483   :  { %v815_v52 = vadd.f32 %v814_v50, %v2291_v25  ;;  %v831_v53 = vsel %vm823_vm15, %v805_v45, %v827_v47  ;;  %1452 = vst [vmem:[#allocation2 + $0x48] sm:$0xff] %v832_v51  ;;  %v837_v25 = vld [vmem:[%s2474_s7 + $0x10] sm:$0xff]  ;;  %v1534_v50 = vld [vmem:[%s2474_s7 + $0x58] sm:$0xff] }
 0x484   :  { %vm826_vm0 = vcmp.ge.f32.partialorder %v820_v49, 0.0  ;;  %v830_v54 = vmul.f32 0.2, %v820_v49  ;;  %v1889_v55 = vpack.c.bf16 %v832_v51, %v831_v53  ;;  %1451 = vst [vmem:[#allocation2 + $0x40] sm:$0xff] %v831_v53  ;;  %v1535_v51 = vld [vmem:[%s2474_s7 + $0x60] sm:$0xff]  ;;  %v1537_v53 = vld [vmem:[%s2474_s7 + $0x70] sm:$0xff] }
 0x485   :  { %vm825_vm1 = vcmp.ge.f32.partialorder %v815_v52, 0.0  ;;  %v829_v22 = vmul.f32 0.2, %v815_v52 }
 0x486   :  { %1890 = vmatprep.subr.bf16.mxu0 %v1889_v55  ;;  %v834_v23 = vsel %vm826_vm0, %v820_v49, %v830_v54  ;;  %v1538_v54 = vld [vmem:[%s2474_s7 + $0x78] sm:$0xff] }
 0x487   :  { %1892 = vmatpush3.bf16.msra.mxu0 %v1889_v55  ;;  %v833_v56 = vsel %vm825_vm1, %v815_v52, %v829_v22  ;;  %1454 = vst [vmem:[#allocation2 + $0x58] sm:$0xff] %v834_v23  ;;  %v1536_v52 = vld [vmem:[%s2474_s7 + $0x68] sm:$0xff]  ;;  %v1555_v55 = vld [vmem:[%s2474_s7 + $0x80] sm:$0xff] }
 0x488   :  { %v1893_v57 = vpack.c.bf16 %v834_v23, %v833_v56  ;;  %1453 = vst [vmem:[#allocation2 + $0x50] sm:$0xff] %v833_v56 }
 0x48a   :  { %1894 = vmatprep.subr.bf16.mxu0 %v1893_v57 }
 0x48b   :  { %1896 = vmatpush3.bf16.msra.mxu0 %v1893_v57 }
 0x48e   :  { %1774 = vmatmul.mubr.msk.f32.vlgmr.msra.gmra.mrb[8].mxu0 %vm891_vm13, %v836_v24 }
 0x48f   :  { %1776 = vmatprep.mubr.msk.f32.mxu0 %vm891_vm13, %v837_v25 }
 0x492   :  { %1777 = vmatmul.mubr.msk.f32.gmra.mrb[10].mxu0 %vm891_vm13, %v838_v58 }
 0x493   :  { %1779 = vmatprep.mubr.msk.f32.mxu0 %vm891_vm13, %v839_v59 }
 0x496   :  { %1780 = vmatmul.mubr.msk.f32.gmra.mrb[12].mxu0 %vm891_vm13, %v840_v60 }
 0x497   :  { %1782 = vmatprep.mubr.msk.f32.mxu0 %vm891_vm13, %v841_v61 }
 0x49a   :  { %1783 = vmatmul.mubr.msk.f32.gmra.mrb[14].mxu0 %vm891_vm13, %v842_v62 }
 0x49b   :  { %1829 = vmatprep.mubr.msk.f32.mxu0 %vm891_vm13, %v1555_v55 }
 0x561   :  { %v1775_v0 = vpop.f32.mrb[8].mxu0 }
 0x562   :  { %v988_v1 = vadd.f32 %v1775_v0, %v2293_v26  ;;  %v982_v2 = vpop.f32.mrb[9].mxu0 }
 0x563   :  { %v983_v3 = vadd.f32 %v982_v2, %v2295_v27 }
 0x564   :  { %vm1022_vm2 = vcmp.ge.f32.partialorder %v988_v1, 0.0  ;;  %v1030_v4 = vmul.f32 5.0, %v988_v1 }
 0x565   :  { %vm1021_vm3 = vcmp.ge.f32.partialorder %v983_v3, 0.0  ;;  %v1029_v5 = vmul.f32 5.0, %v983_v3  ;;  %v1778_v6 = vpop.f32.mrb[10].mxu0 }
 0x566   :  { %v998_v7 = vadd.f32 %v1778_v6, %v2297_v28  ;;  %v992_v8 = vpop.f32.mrb[11].mxu0  ;;  %v1038_v9 = vsel %vm1022_vm2, %v988_v1, %v1030_v4 }
 0x567   :  { %v993_v10 = vadd.f32 %v992_v8, %v2299_v29  ;;  %v1037_v11 = vsel %vm1021_vm3, %v983_v3, %v1029_v5 }
 0x568   :  { %vm1024_vm4 = vcmp.ge.f32.partialorder %v998_v7, 0.0  ;;  %v1032_v12 = vmul.f32 5.0, %v998_v7  ;;  %v1897_v13 = vpack.c.bf16 %v1038_v9, %v1037_v11 }
 0x569   :  { %vm1023_vm5 = vcmp.ge.f32.partialorder %v993_v10, 0.0  ;;  %v1031_v26 = vmul.f32 5.0, %v993_v10  ;;  %v1781_v18 = vpop.f32.mrb[12].mxu0 }
 0x56a   :  { %v1008_v27 = vadd.f32 %v1781_v18, %v2301_v30  ;;  %v1002_v14 = vpop.f32.mrb[13].mxu0  ;;  %1898 = vmatprep.subr.bf16.mxu1 %v1897_v13  ;;  %v1040_v15 = vsel %vm1024_vm4, %v998_v7, %v1032_v12 }
 0x56b   :  { %v1003_v19 = vadd.f32 %v1002_v14, %v2303_v31  ;;  %1900 = vmatpush3.bf16.msra.mxu1 %v1897_v13  ;;  %v1039_v28 = vsel %vm1023_vm5, %v993_v10, %v1031_v26 }
 0x56c   :  { %vm1026_vm6 = vcmp.ge.f32.partialorder %v1008_v27, 0.0  ;;  %v1034_v16 = vmul.f32 5.0, %v1008_v27  ;;  %v1901_v17 = vpack.c.bf16 %v1040_v15, %v1039_v28  ;;  %v1558_v15 = vld [vmem:[%s2474_s7 + $0x98] sm:$0xff]  ;;  %v1560_v28 = vld [vmem:[%s2474_s7 + $0xa8] sm:$0xff] }
 0x56d   :  { %vm1025_vm7 = vcmp.ge.f32.partialorder %v1003_v19, 0.0  ;;  %v1033_v29 = vmul.f32 5.0, %v1003_v19  ;;  %v1784_v20 = vpop.f32.mrb[14].mxu0 }
 0x56e   :  { %v1018_v21 = vadd.f32 %v1784_v20, %v2305_v32  ;;  %v1012_v41 = vpop.f32.mrb[15].mxu0  ;;  %1902 = vmatprep.subr.bf16.mxu1 %v1901_v17  ;;  %v1042_v43 = vsel %vm1026_vm6, %v1008_v27, %v1034_v16  ;;  %v1532_v32 = vld [vmem:[%s2474_s7 + $0x48] sm:$0xff]  ;;  %v1561_v16 = vld [vmem:[%s2474_s7 + $0xb0] sm:$0xff]  ;;  %v1277_v20 = vpop.permute.xlu0 %1276 }
 0x56f   :  { %v1013_v30 = vadd.f32 %v1012_v41, %v2307_v33  ;;  %1904 = vmatpush3.bf16.msra.mxu1 %v1901_v17  ;;  %v1041_v44 = vsel %vm1025_vm7, %v1003_v19, %v1033_v29  ;;  %v1533_v33 = vld [vmem:[%s2474_s7 + $0x50] sm:$0xff]  ;;  %v1559_v19 = vld [vmem:[%s2474_s7 + $0xa0] sm:$0xff]  ;;  %v1562_v17 = vld [vmem:[%s2474_s7 + $0xb8] sm:$0xff]  ;;  %v1282_v29 = vpop.permute.xlu1 %1281 }
 0x570   :  { %vm1028_vm8 = vcmp.ge.f32.partialorder %v1018_v21, 0.0  ;;  %v1036_v45 = vmul.f32 5.0, %v1018_v21  ;;  %v1905_v31 = vpack.c.bf16 %v1042_v43, %v1041_v44 }
 0x571   :  { %vm1027_vm9 = vcmp.ge.f32.partialorder %v1013_v30, 0.0  ;;  %v1035_v46 = vmul.f32 5.0, %v1013_v30 }
 0x572   :  { %1906 = vmatprep.subr.bf16.mxu1 %v1905_v31  ;;  %v1044_v47 = vsel %vm1028_vm8, %v1018_v21, %v1036_v45  ;;  %v1287_v43 = vpop.permute.xlu0 %1286 }
 0x573   :  { %1908 = vmatpush3.bf16.msra.mxu1 %v1905_v31  ;;  %v1043_v48 = vsel %vm1027_vm9, %v1013_v30, %v1035_v46  ;;  %v1292_v21 = vpop.permute.xlu1 %1291 }
 0x574   :  { %v1909_v49 = vpack.c.bf16 %v1044_v47, %v1043_v48 }
 0x576   :  { %1910 = vmatprep.subr.bf16.mxu1 %v1909_v49 }
 0x577   :  { %1912 = vmatpush3.bf16.msra.mxu1 %v1909_v49  ;;  %v1302_v48 = vpop.permute.xlu1 %1301 }
 0x57a   :  { %1802 = vmatmul.mubr.msk.f32.vlgmr.msra.gmra.mrb[20].mxu1 %vm891_vm13, %v1532_v32  ;;  %v1297_v32 = vpop.permute.xlu0 %1296 }
 0x57b   :  { %1804 = vmatprep.mubr.msk.f32.mxu1 %vm891_vm13, %v1533_v33 }
 0x57e   :  { %1805 = vmatmul.mubr.msk.f32.gmra.mrb[22].mxu1 %vm891_vm13, %v1534_v50  ;;  %v1307_v55 = vpop.permute.xlu0 %1306 }
 0x57f   :  { %1807 = vmatprep.mubr.msk.f32.mxu1 %vm891_vm13, %v1535_v51 }
 0x582   :  { %1808 = vmatmul.mubr.msk.f32.gmra.mrb[24].mxu1 %vm891_vm13, %v1536_v52 }
 0x583   :  { %1810 = vmatprep.mubr.msk.f32.mxu1 %vm891_vm13, %v1537_v53  ;;  %v1312_v53 = vpop.permute.xlu1 %1311 }
 0x586   :  { %1811 = vmatmul.mubr.msk.f32.gmra.mrb[26].mxu1 %vm891_vm13, %v1538_v54 }
 0x64d   :  { %v1803_v22 = vpop.f32.mrb[20].mxu1 }
 0x64e   :  { %v1199_v23 = vadd.f32 %v1803_v22, %v2309_v34  ;;  %v1193_v56 = vpop.f32.mrb[21].mxu1 }
 0x64f   :  { %v1194_v57 = vadd.f32 %v1193_v56, %v2311_v35 }
 0x650   :  { %vm1233_vm10 = vcmp.ge.f32.partialorder %v1199_v23, 0.0  ;;  %v1241_v24 = vmul.f32 5.0, %v1199_v23 }
 0x651   :  { %vm1232_vm11 = vcmp.ge.f32.partialorder %v1194_v57, 0.0  ;;  %v1240_v25 = vmul.f32 5.0, %v1194_v57  ;;  %v1806_v58 = vpop.f32.mrb[22].mxu1 }
 0x652   :  { %v1209_v59 = vadd.f32 %v1806_v58, %v2313_v36  ;;  %v1203_v60 = vpop.f32.mrb[23].mxu1  ;;  %v1249_v61 = vsel %vm1233_vm10, %v1199_v23, %v1241_v24 }
 0x653   :  { %v1204_v62 = vadd.f32 %v1203_v60, %v2315_v37  ;;  %v1248_v63 = vsel %vm1232_vm11, %v1194_v57, %v1240_v25 }
 0x654   :  { %vm1235_vm12 = vcmp.ge.f32.partialorder %v1209_v59, 0.0  ;;  %v1243_v0 = vmul.f32 5.0, %v1209_v59  ;;  %v1913_v1 = vpack.c.bf16 %v1249_v61, %v1248_v63 }
 0x655   :  { %vm1234_vm14 = vcmp.ge.f32.partialorder %v1204_v62, 0.0  ;;  %v1242_v34 = vmul.f32 5.0, %v1204_v62  ;;  %v1809_v2 = vpop.f32.mrb[24].mxu1 }
 0x656   :  { %v1219_v35 = vadd.f32 %v1809_v2, %v2317_v38  ;;  %v1213_v3 = vpop.f32.mrb[25].mxu1  ;;  %1914 = vmatprep.subr.bf16.mxu0 %v1913_v1  ;;  %v1251_v4 = vsel %vm1235_vm12, %v1209_v59, %v1243_v0 }
 0x657   :  { %v1214_v5 = vadd.f32 %v1213_v3, %v2319_v39  ;;  %1916 = vmatpush3.bf16.msra.mxu0 %v1913_v1  ;;  %v1250_v36 = vsel %vm1234_vm14, %v1204_v62, %v1242_v34 }
 0x658   :  { %vm1237_vm15 = vcmp.ge.f32.partialorder %v1219_v35, 0.0  ;;  %v1245_v6 = vmul.f32 5.0, %v1219_v35  ;;  %v1917_v7 = vpack.c.bf16 %v1251_v4, %v1250_v36 }
 0x659   :  { %vm1236_vm0 = vcmp.ge.f32.partialorder %v1214_v5, 0.0  ;;  %v1244_v37 = vmul.f32 5.0, %v1214_v5  ;;  %v1812_v8 = vpop.f32.mrb[26].mxu1 }
 0x65a   :  { %v1229_v9 = vadd.f32 %v1812_v8, %v2321_v40  ;;  %v1223_v10 = vpop.f32.mrb[27].mxu1  ;;  %1918 = vmatprep.subr.bf16.mxu0 %v1917_v7  ;;  %v1253_v11 = vsel %vm1237_vm15, %v1219_v35, %v1245_v6  ;;  %v1556_v40 = vld [vmem:[%s2474_s7 + $0x88] sm:$0xff] }
 0x65b   :  { %v1224_v38 = vadd.f32 %v1223_v10, %v2323_v42  ;;  %1920 = vmatpush3.bf16.msra.mxu0 %v1917_v7  ;;  %v1252_v12 = vsel %vm1236_vm0, %v1214_v5, %v1244_v37  ;;  %v1557_v42 = vld [vmem:[%s2474_s7 + $0x90] sm:$0xff]  ;;  %s1960_s7 = smov [#allocation2]  }
 0x65c   :  { %vm1239_vm1 = vcmp.ge.f32.partialorder %v1229_v9, 0.0  ;;  %v1247_v13 = vmul.f32 5.0, %v1229_v9  ;;  %v1921_v39 = vpack.c.bf16 %v1253_v11, %v1252_v12  ;;  %s1468_s21 = sshll.u32 %s1960_s7, 4  ;;  %s1469_s21 = int_to_ptr.vmem [resolvable:$true] %s1468_s21 }
 0x65d   :  { %vm1238_vm2 = vcmp.ge.f32.partialorder %v1224_v38, 0.0  ;;  %v1246_v26 = vmul.f32 5.0, %v1224_v38  ;;  %s1935_s22 = scalar_lea.vmem %s1469_s21, 2560  ;;  %p1940_p1 = scmp.lt.s32.totalorder %s1469_s21, %s1469_s21 }
 0x65e   :  { %1922 = vmatprep.subr.bf16.mxu0 %v1921_v39  ;;  %v1255_v18 = vsel %vm1239_vm1, %v1229_v9, %v1247_v13  ;;  %p1936_p0 = scmp.ne.s32.totalorder %s1469_s21, %s1935_s22  ;;  %p1941_p2 = scmp.lt.s32.totalorder %s1935_s22, %s1935_s22 }
 0x65f   :  { %1924 = vmatpush3.bf16.msra.mxu0 %v1921_v39  ;;  %v1254_v27 = vsel %vm1238_vm2, %v1224_v38, %v1246_v26 }
 0x660   :  { %v1925_v14 = vpack.c.bf16 %v1255_v18, %v1254_v27  ;;  %p1942_p3 = por %p1941_p2, %p1940_p1 }
 0x662   :  { %1926 = vmatprep.subr.bf16.mxu0 %v1925_v14  ;;  %p1943_p4 = pnand %p1942_p3, %p1936_p0 }
 0x663   :  { %1928 = vmatpush3.bf16.msra.mxu0 %v1925_v14 }
 0x666   :  { %1830 = vmatmul.mubr.msk.f32.vlgmr.msra.gmra.mrb[16].mxu0 %vm891_vm13, %v1556_v40 }
 0x667   :  { %1832 = vmatprep.mubr.msk.f32.mxu0 %vm891_vm13, %v1557_v42 }
 0x66a   :  { %1833 = vmatmul.mubr.msk.f32.gmra.mrb[18].mxu0 %vm891_vm13, %v1558_v15 }
 0x66b   :  { %1835 = vmatprep.mubr.msk.f32.mxu0 %vm891_vm13, %v1559_v19 }
 0x66e   :  { %1836 = vmatmul.mubr.msk.f32.gmra.mrb[20].mxu0 %vm891_vm13, %v1560_v28 }
 0x66f   :  { %1838 = vmatprep.mubr.msk.f32.mxu0 %vm891_vm13, %v1561_v16 }
 0x672   :  { %1839 = vmatmul.mubr.msk.f32.gmra.mrb[22].mxu0 %vm891_vm13, %v1562_v17 }
 0x739   :  { %v1831_v41 = vpop.f32.mrb[16].mxu0 }
 0x73a   :  { %v1410_v30 = vadd.f32 %v1831_v41, %v1282_v29  ;;  %v1404_v44 = vpop.f32.mrb[17].mxu0 }
 0x73b   :  { %v1405_v45 = vadd.f32 %v1404_v44, %v1277_v20 }
 0x73c   :  { %1456 = vst [vmem:[#allocation2 + $0x68] sm:$0xff] %v1410_v30 }
 0x73d   :  { %1455 = vst [vmem:[#allocation2 + $0x60] sm:$0xff] %v1405_v45  ;;  %v1834_v31 = vpop.f32.mrb[18].mxu0 }
 0x73e   :  { %v1420_v46 = vadd.f32 %v1834_v31, %v1292_v21  ;;  %v1414_v47 = vpop.f32.mrb[19].mxu0 }
 0x73f   :  { %v1415_v49 = vadd.f32 %v1414_v47, %v1287_v43 }
 0x740   :  { %1458 = vst [vmem:[#allocation2 + $0x78] sm:$0xff] %v1420_v46 }
 0x741   :  { %1457 = vst [vmem:[#allocation2 + $0x70] sm:$0xff] %v1415_v49  ;;  %v1837_v33 = vpop.f32.mrb[20].mxu0 }
 0x742   :  { %v1430_v50 = vadd.f32 %v1837_v33, %v1302_v48  ;;  %v1424_v51 = vpop.f32.mrb[21].mxu0 }
 0x743   :  { %v1425_v52 = vadd.f32 %v1424_v51, %v1297_v32 }
 0x744   :  { %1460 = vst [vmem:[#allocation2 + $0x88] sm:$0xff] %v1430_v50 }
 0x745   :  { %1459 = vst [vmem:[#allocation2 + $0x80] sm:$0xff] %v1425_v52  ;;  %v1840_v54 = vpop.f32.mrb[22].mxu0 }
 0x746   :  { %v1440_v22 = vadd.f32 %v1840_v54, %v1312_v53  ;;  %v1434_v23 = vpop.f32.mrb[23].mxu0 }
 0x747   :  { %v1435_v56 = vadd.f32 %v1434_v23, %v1307_v55 }
 0x748   :  { %1462 = vst [vmem:[#allocation2 + $0x98] sm:$0xff] %v1440_v22 }
 0x749   :  { %1461 = vst [vmem:[#allocation2 + $0x90] sm:$0xff] %v1435_v56 }
 0x74a   :  { %1946 = shalt.err (!%p1943_p4)
}
 0x74b   :  { %s1947_s3 = scalar_lea.hbm %s2476_s9, 2560 }
 0x74c   :  { %p1948_p5 = scmp.ne.s32.totalorder %s2476_s9, %s1947_s3  ;;  %p1951_p6 = scmp.lt.u32.totalorder %s1947_s3, %s2476_s9 }
 0x74e   :  { %p1953_p7 = pnand %p1951_p6, %p1948_p5 }
 0x750   :  { %1956 = shalt.err (!%p1953_p7)
}
 0x751   :  { %s1961_s4 = smov 128   ;;  %s1962_s27 = smov 8  }
 0x752   :  { %1474 = dma.vmem_to_hbm [thread:$0]  %s1469_s21, 2560, %s2476_s9, [#allocation3], %s1961_s4, %s1961_s4, %s1962_s27  }
 0x753   :  { %1957 = dma.done.wait [#allocation3], 2560  }
 0x754   :  { %1958 = vsyncadd [#allocation3], 4294964736 }
 0x755   :  { %1478 = vsyncpa [#allocation3], 1 }

</bundles_post_ra>
